<compile_context>
chip_gen: v5e
topology: v5e:2x2
jax: 0.10.0
libtpu: 0.0.40
codegen_flags: <defaults>
</compile_context>

<pallas_src>
import functools

import jax
import jax.numpy as jnp
from jax.experimental import pallas as pl
from jax.experimental.pallas import tpu as pltpu


def _num_tensorcores() -> int:
    """TensorCores behind one JAX device (2 on v4/v5p/v7x megacore chips)."""
    # Preferred: ask the TPU info query (robust under AOT / interpret mode).
    try:
        info = pltpu.get_tpu_info()
        for attr in ("num_cores", "core_count", "num_tensorcores",
                     "tensorcores_per_chip"):
            n = getattr(info, attr, None)
            if isinstance(n, int) and n > 0:
                return n
    except Exception:
        pass
    # Fallback: device_kind string.
    try:
        kind = jax.devices()[0].device_kind.lower()
    except Exception:
        return 1
    return 2 if any(tag in kind for tag in ("v4", "v5p", "v7")) else 1


def _choose_batch_block(B: int, max_bblk: int, num_cores: int):
    """Pick (b_blk, grid_b).

    b_blk is either the full batch (single VMEM-resident step) or a multiple
    of 8 so the 2D block's sublane dim stays dense; on megacore chips grid_b
    is kept a multiple of the core count so both TensorCores get equal work.
    """
    if B <= max_bblk and (num_cores <= 1 or B < 16):
        # Single-TC chips (v5e/v6e): fewest steps wins (per-step overhead
        # dominates at small shapes).  B < 16 can't split into two dense
        # multiple-of-8 blocks anyway.
        return B, 1
    max_bblk8 = max(8, (max_bblk // 8) * 8)
    steps = pl.cdiv(B, max_bblk8)
    if num_cores > 1:
        steps = pl.cdiv(steps, num_cores) * num_cores   # balance across TCs
    b_blk = min(max_bblk8, pl.cdiv(pl.cdiv(B, steps), 8) * 8)
    return b_blk, pl.cdiv(B, b_blk)


def _speaker_add_kernel(seq_len, x_ref, sp_ref, o_ref):
    # x_ref : (b_blk, T*H)  lane-dense input slab
    # sp_ref: (b_blk, H)    speaker embeddings for the same batch rows
    # o_ref : (b_blk, T*H)
    # Build the speaker slab once per step (VMEM-only traffic, hidden under
    # the HBM DMA of x/out), then one VPU add with unmasked lane-dense stores.
    o_ref[...] = x_ref[...] + jnp.tile(sp_ref[...], (1, seq_len))


def _speaker_integrator_pallas_impl(x, spembs):
    """out[b, t, :] = x[b, t, :] + spembs[b, :]  (always via the Pallas kernel)."""
    B, T, H = x.shape
    assert spembs.shape == (B, H)
    itemsize = jnp.dtype(x.dtype).itemsize
    TH = T * H

    x2 = x.reshape(B, TH)            # free: contiguous row-major collapse
    sp2 = spembs.astype(x.dtype)     # add runs in x's dtype (bf16-friendly)

    # Conservative VMEM budget (also fits v7x's smaller 64 MiB VMEM / 32 MiB
    # default scoped limit).  Per step: x + out blocks double-buffered plus
    # the in-kernel tiled speaker slab -> ~5 block-rows of bytes per batch row.
    vmem_budget = 8 * 1024 * 1024
    bytes_per_row = TH * itemsize
    max_bblk = max(1, vmem_budget // (5 * bytes_per_row))

    b_blk, grid_b = _choose_batch_block(B, max_bblk, _num_tensorcores())

    cost = pl.CostEstimate(
        flops=B * TH,
        transcendentals=0,
        bytes_accessed=2 * B * TH * itemsize + B * H * itemsize,
    )

    out2 = pl.pallas_call(
        functools.partial(_speaker_add_kernel, T),
        out_shape=jax.ShapeDtypeStruct((B, TH), x.dtype),
        grid_spec=pltpu.PrefetchScalarGridSpec(
            num_scalar_prefetch=0,
            grid=(grid_b,),
            in_specs=[
                pl.BlockSpec((b_blk, TH), lambda b: (b, 0)),
                pl.BlockSpec((b_blk, H), lambda b: (b, 0)),
            ],
            out_specs=pl.BlockSpec((b_blk, TH), lambda b: (b, 0)),
        ),
        compiler_params=pltpu.CompilerParams(
            dimension_semantics=("parallel",),
        ),
        cost_estimate=cost,
    )(x2, sp2)
    return out2.reshape(B, T, H)


speaker_integrator_pallas = jax.jit(_speaker_integrator_pallas_impl)


def _speaker_integrator_auto(x, spembs):
    # At tiny sizes the fixed custom-call + DMA-setup overhead dwarfs the HBM
    # time; let XLA fuse the broadcast-add into neighboring ops instead.  The
    # Pallas kernel earns its keep once a meaningful number of bytes move.
    B, T, H = x.shape
    total_bytes = 2 * B * T * H * jnp.dtype(x.dtype).itemsize
    if total_bytes < (1 << 20):
        return x + spembs.astype(x.dtype)[:, None, :]
    return _speaker_integrator_pallas_impl(x, spembs)


speaker_integrator = jax.jit(_speaker_integrator_auto)


if __name__ == "__main__":
    # Shapes from the module docstring: (batch, 39, 256) and (batch, 256).
    B, T, H = 2, 39, 256
    key = jax.random.PRNGKey(0)
    kx, ks = jax.random.split(key)
    x = jax.random.normal(kx, (B, T, H), dtype=jnp.float32)
    spembs = jax.random.normal(ks, (B, H), dtype=jnp.float32)

    # f32 path — force the Pallas kernel even at this tiny size.
    out = jax.block_until_ready(speaker_integrator_pallas(x, spembs))
    ref = x + spembs[:, None, :]
    assert out.shape == (B, T, H)
    assert out.dtype == x.dtype
    assert jnp.allclose(out, ref, atol=1e-6, rtol=1e-6)

    # bf16 end-to-end path (recommended caller contract: halves HBM traffic).
    xb = x.astype(jnp.bfloat16)
    sb = spembs.astype(jnp.bfloat16)
    outb = jax.block_until_ready(speaker_integrator_pallas(xb, sb))
    refb = xb + sb[:, None, :]
    assert outb.dtype == jnp.bfloat16
    assert jnp.allclose(outb.astype(jnp.float32), refb.astype(jnp.float32),
                        atol=1e-2, rtol=1e-2)

    # Larger batch exercises the blocked / auto-dispatch path (~2.5 MiB).
    B2 = 32
    x_big = jax.random.normal(kx, (B2, T, H), dtype=jnp.float32)
    s_big = jax.random.normal(ks, (B2, H), dtype=jnp.float32)
    out_big = jax.block_until_ready(speaker_integrator(x_big, s_big))
    ref_big = x_big + s_big[:, None, :]
    assert jnp.allclose(out_big, ref_big, atol=1e-6, rtol=1e-6)

    print("KERNEL_OK")
</pallas_src>

<mosaic_0001>
module attributes {stable_mosaic.version = 11 : i64} {
  func.func @_speaker_add_kernel(%arg0: i32, %arg1: memref<2x9984xf32, #tpu.memory_space<vmem>>, %arg2: memref<2x256xf32, #tpu.memory_space<vmem>>, %arg3: memref<2x9984xf32, #tpu.memory_space<vmem>>) attributes {dimension_semantics = [#tpu.dimension_semantics<parallel>], iteration_bounds = array<i64: 1>, scalar_prefetch = 0 : i64, scratch_operands = 0 : i64, tpu.core_type = #tpu.core_type<tc>, window_params = [{transform_indices = @transform_0, window_bounds = array<i64: 2, 9984>}, {transform_indices = @transform_1, window_bounds = array<i64: 2, 256>}, {transform_indices = @transform_2, window_bounds = array<i64: 2, 9984>}]} {
    %c0 = arith.constant 0 : index
    %c0_0 = arith.constant 0 : index
    %0 = vector.load %arg1[%c0, %c0_0] : memref<2x9984xf32, #tpu.memory_space<vmem>>, vector<2x9984xf32>
    %c0_1 = arith.constant 0 : index
    %c0_2 = arith.constant 0 : index
    %1 = vector.load %arg2[%c0_1, %c0_2] : memref<2x256xf32, #tpu.memory_space<vmem>>, vector<2x256xf32>
    %2 = tpu.concatenate %1, %1, %1, %1, %1, %1, %1, %1, %1, %1, %1, %1, %1, %1, %1, %1, %1, %1, %1, %1, %1, %1, %1, %1, %1, %1, %1, %1, %1, %1, %1, %1, %1, %1, %1, %1, %1, %1, %1 in 1 : vector<2x256xf32>, vector<2x256xf32>, vector<2x256xf32>, vector<2x256xf32>, vector<2x256xf32>, vector<2x256xf32>, vector<2x256xf32>, vector<2x256xf32>, vector<2x256xf32>, vector<2x256xf32>, vector<2x256xf32>, vector<2x256xf32>, vector<2x256xf32>, vector<2x256xf32>, vector<2x256xf32>, vector<2x256xf32>, vector<2x256xf32>, vector<2x256xf32>, vector<2x256xf32>, vector<2x256xf32>, vector<2x256xf32>, vector<2x256xf32>, vector<2x256xf32>, vector<2x256xf32>, vector<2x256xf32>, vector<2x256xf32>, vector<2x256xf32>, vector<2x256xf32>, vector<2x256xf32>, vector<2x256xf32>, vector<2x256xf32>, vector<2x256xf32>, vector<2x256xf32>, vector<2x256xf32>, vector<2x256xf32>, vector<2x256xf32>, vector<2x256xf32>, vector<2x256xf32>, vector<2x256xf32> -> vector<2x9984xf32>
    %3 = arith.addf %0, %2 : vector<2x9984xf32>
    %c0_3 = arith.constant 0 : index
    %c0_4 = arith.constant 0 : index
    %4 = vector.load %arg3[%c0_3, %c0_4] : memref<2x9984xf32, #tpu.memory_space<vmem>>, vector<2x9984xf32>
    tpu.vector_store %arg3[%c0_3, %c0_4], %3 {strides = array<i32>} : memref<2x9984xf32, #tpu.memory_space<vmem>>, vector<2x9984xf32>,
    return
  }
  func.func @transform_0(%arg0: i32) -> (i32, i32) {
    %c0_i32 = arith.constant 0 : i32
    %c0_i32_0 = arith.constant 0 : i32
    return %arg0, %c0_i32 : i32, i32
  }
  func.func @transform_1(%arg0: i32) -> (i32, i32) {
    %c0_i32 = arith.constant 0 : i32
    %c0_i32_0 = arith.constant 0 : i32
    return %arg0, %c0_i32 : i32, i32
  }
  func.func @transform_2(%arg0: i32) -> (i32, i32) {
    %c0_i32 = arith.constant 0 : i32
    %c0_i32_0 = arith.constant 0 : i32
    return %arg0, %c0_i32 : i32, i32
  }
}

</mosaic_0001>

<bundles_post_ra>
// kernel: _speaker_integrator_pallas_impl.1
= control target key start
LH: loop header
LB: loop body
LE: loop exit
PB: predicated region body
PF: predicated region fallthrough
CT: control target
= control target key end

     0   :  { %7 = vsyncpa [#allocation3], 0  ;;  %s583_s0 = inlined_call_operand.hbm [shape: f32[2,9984], index: 0, kind: input, shape index: {}]   ;;  %s584_s1 = inlined_call_operand.hbm [shape: f32[2,256], index: 1, kind: input, shape index: {}]   ;;  %s585_s2 = inlined_call_operand.hbm [shape: f32[2,9984], index: 2, kind: output, shape index: {}]  }
   0x1   :  { %8 = vsyncpa [#allocation6], 0 }
   0x2   :  { %9 = vsyncpa [#allocation4], 0  ;;  %s15_s11 = sshll.u32 %s583_s0, 4  ;;  %s457_s12 = smov [#allocation2]   ;;  %s16_s11 = int_to_ptr.hbm [resolvable:$true] %s15_s11 }
   0x3   :  { %s17_s13 = sshll.u32 %s457_s12, 4  ;;  %s26_s16 = sshll.u32 %s584_s1, 4  ;;  %s18_s13 = int_to_ptr.vmem [resolvable:$true] %s17_s13  ;;  %s27_s16 = int_to_ptr.hbm [resolvable:$true] %s26_s16 }
   0x4   :  { %20 = dma.hbm_to_vmem [thread:$0]  %s16_s11, 2496, %s18_s13, [#allocation3]  }
   0x5   :  { %s458_s17 = smov [#allocation5]  }
   0x6   :  { %s28_s18 = sshll.u32 %s458_s17, 4  ;;  %s29_s18 = int_to_ptr.vmem [resolvable:$true] %s28_s18 }
   0x7   :  { %31 = dma.hbm_to_vmem [thread:$0]  %s27_s16, 64, %s29_s18, [#allocation6]  }
   0x8   :  { %451 = dma.done.wait [#allocation3], 2496  }
   0x9   :  { %452 = vsyncadd [#allocation3], 4294964800 }
   0xa   :  { %453 = dma.done.wait [#allocation6], 64  }
   0xb   :  { %454 = vsyncadd [#allocation6], 4294967232  ;;  %v481_v0 = vld [vmem:[#allocation5] sm:$0xf]  ;;  %vm237_vm0 = vcmask 1041408   ;;  %vm239_vm1 = vcmask 1045508  }
   0xc   :  { %62 = vst [vmem:[#allocation1] ss:$4 sm:$0xff] %v481_v0  ;;  %vm241_vm2 = vcmask 1043456   ;;  %v40_v8 = vld [vmem:[#allocation2] sm:$0xff]  ;;  %v41_v20 = vld [vmem:[#allocation2 + $0x8] sm:$0xff]  ;;  %v42_v32 = vld [vmem:[#allocation2 + $0x10] sm:$0xff] }
   0xd   :  { %v43_v44 = vld [vmem:[#allocation2 + $0x18] sm:$0xff]  ;;  %v44_v56 = vld [vmem:[#allocation2 + $0x20] sm:$0xff]  ;;  %s459_s0 = smov [#allocation7]   ;;  %s365_s21 = sshll.u32 %s585_s2, 4  ;;  %s366_s21 = int_to_ptr.hbm [resolvable:$true] %s365_s21 }
   0xe   :  { %s363_s1 = sshll.u32 %s459_s0, 4  ;;  %s364_s1 = int_to_ptr.vmem [resolvable:$true] %s363_s1 }
  0x13   :  { %v63_v1 = vld.sshfl [vmem:[#allocation1] sm:$0xff pattern:$0x73625140]  ;;  %v64_v2 = vld.sshfl [vmem:[#allocation1 + $0x8] sm:$0xff pattern:$0x73625140] }
  0x14   :  { %65 = vst [vmem:[#allocation1] ss:$4 sm:$0xff] %v481_v0  ;;  %v179_v3 = vrot.slane %v64_v2, 6 }
  0x16   :  { %v238_v9 = vsel %vm237_vm0, %v63_v1, %v179_v3 }
  0x1b   :  { %v66_v4 = vld.sshfl [vmem:[#allocation1] sm:$0xff pattern:$0x73625140]  ;;  %v67_v5 = vld.sshfl [vmem:[#allocation1 + $0x8] sm:$0xff pattern:$0x73625140] }
  0x1c   :  { %68 = vst [vmem:[#allocation1] ss:$4 sm:$0xff] %v481_v0  ;;  %v180_v6 = vrot.slane %v66_v4, 4  ;;  %v181_v7 = vrot.slane %v67_v5, 2  ;;  %v45_v5 = vld [vmem:[#allocation2 + $0x28] sm:$0xff] }
  0x1e   :  { %v240_v10 = vsel %vm239_vm1, %v180_v6, %v181_v7 }
  0x1f   :  { %v242_v11 = vsel %vm241_vm2, %v238_v9, %v240_v10 }
  0x20   :  { %v318_v12 = vadd.f32 %v242_v11, %v40_v8 }
  0x22   :  { %338 = vst [vmem:[#allocation7] sm:$0xff] %v318_v12 }
  0x23   :  { %v69_v13 = vld.sshfl [vmem:[#allocation1] sm:$0xff pattern:$0x73625140]  ;;  %v70_v14 = vld.sshfl [vmem:[#allocation1 + $0x8] sm:$0xff pattern:$0x73625140] }
  0x24   :  { %71 = vst [vmem:[#allocation1] ss:$4 sm:$0xff] %v481_v0  ;;  %v182_v15 = vrot.slane %v70_v14, 6 }
  0x26   :  { %v243_v21 = vsel %vm237_vm0, %v69_v13, %v182_v15 }
  0x2b   :  { %v72_v16 = vld.sshfl [vmem:[#allocation1] sm:$0xff pattern:$0x73625140]  ;;  %v73_v17 = vld.sshfl [vmem:[#allocation1 + $0x8] sm:$0xff pattern:$0x73625140] }
  0x2c   :  { %74 = vst [vmem:[#allocation1] ss:$4 sm:$0xff] %v481_v0  ;;  %v183_v18 = vrot.slane %v72_v16, 4  ;;  %v184_v19 = vrot.slane %v73_v17, 2  ;;  %v46_v17 = vld [vmem:[#allocation2 + $0x30] sm:$0xff] }
  0x2e   :  { %v244_v22 = vsel %vm239_vm1, %v183_v18, %v184_v19 }
  0x2f   :  { %v245_v23 = vsel %vm241_vm2, %v243_v21, %v244_v22 }
  0x30   :  { %v319_v24 = vadd.f32 %v245_v23, %v41_v20 }
  0x32   :  { %339 = vst [vmem:[#allocation7 + $0x8] sm:$0xff] %v319_v24 }
  0x33   :  { %v75_v25 = vld.sshfl [vmem:[#allocation1] sm:$0xff pattern:$0x73625140]  ;;  %v76_v26 = vld.sshfl [vmem:[#allocation1 + $0x8] sm:$0xff pattern:$0x73625140] }
  0x34   :  { %77 = vst [vmem:[#allocation1] ss:$4 sm:$0xff] %v481_v0  ;;  %v185_v27 = vrot.slane %v76_v26, 6 }
  0x36   :  { %v246_v33 = vsel %vm237_vm0, %v75_v25, %v185_v27 }
  0x3b   :  { %v78_v28 = vld.sshfl [vmem:[#allocation1] sm:$0xff pattern:$0x73625140]  ;;  %v79_v29 = vld.sshfl [vmem:[#allocation1 + $0x8] sm:$0xff pattern:$0x73625140] }
  0x3c   :  { %80 = vst [vmem:[#allocation1] ss:$4 sm:$0xff] %v481_v0  ;;  %v186_v30 = vrot.slane %v78_v28, 4  ;;  %v187_v31 = vrot.slane %v79_v29, 2  ;;  %v47_v29 = vld [vmem:[#allocation2 + $0x38] sm:$0xff] }
  0x3e   :  { %v247_v34 = vsel %vm239_vm1, %v186_v30, %v187_v31 }
  0x3f   :  { %v248_v35 = vsel %vm241_vm2, %v246_v33, %v247_v34 }
  0x40   :  { %v320_v36 = vadd.f32 %v248_v35, %v42_v32 }
  0x42   :  { %340 = vst [vmem:[#allocation7 + $0x10] sm:$0xff] %v320_v36 }
  0x43   :  { %v81_v37 = vld.sshfl [vmem:[#allocation1] sm:$0xff pattern:$0x73625140]  ;;  %v82_v38 = vld.sshfl [vmem:[#allocation1 + $0x8] sm:$0xff pattern:$0x73625140] }
  0x44   :  { %83 = vst [vmem:[#allocation1] ss:$4 sm:$0xff] %v481_v0  ;;  %v188_v39 = vrot.slane %v82_v38, 6 }
  0x46   :  { %v249_v45 = vsel %vm237_vm0, %v81_v37, %v188_v39 }
  0x4b   :  { %v84_v40 = vld.sshfl [vmem:[#allocation1] sm:$0xff pattern:$0x73625140]  ;;  %v85_v41 = vld.sshfl [vmem:[#allocation1 + $0x8] sm:$0xff pattern:$0x73625140] }
  0x4c   :  { %86 = vst [vmem:[#allocation1] ss:$4 sm:$0xff] %v481_v0  ;;  %v189_v42 = vrot.slane %v84_v40, 4  ;;  %v190_v43 = vrot.slane %v85_v41, 2  ;;  %v48_v41 = vld [vmem:[#allocation2 + $0x40] sm:$0xff] }
  0x4e   :  { %v250_v46 = vsel %vm239_vm1, %v189_v42, %v190_v43 }
  0x4f   :  { %v251_v47 = vsel %vm241_vm2, %v249_v45, %v250_v46 }
  0x50   :  { %v321_v48 = vadd.f32 %v251_v47, %v43_v44 }
  0x52   :  { %341 = vst [vmem:[#allocation7 + $0x18] sm:$0xff] %v321_v48 }
  0x53   :  { %v87_v49 = vld.sshfl [vmem:[#allocation1] sm:$0xff pattern:$0x73625140]  ;;  %v88_v50 = vld.sshfl [vmem:[#allocation1 + $0x8] sm:$0xff pattern:$0x73625140] }
  0x54   :  { %89 = vst [vmem:[#allocation1] ss:$4 sm:$0xff] %v481_v0  ;;  %v191_v51 = vrot.slane %v88_v50, 6 }
  0x56   :  { %v252_v57 = vsel %vm237_vm0, %v87_v49, %v191_v51 }
  0x5b   :  { %v90_v52 = vld.sshfl [vmem:[#allocation1] sm:$0xff pattern:$0x73625140]  ;;  %v91_v53 = vld.sshfl [vmem:[#allocation1 + $0x8] sm:$0xff pattern:$0x73625140] }
  0x5c   :  { %92 = vst [vmem:[#allocation1] ss:$4 sm:$0xff] %v481_v0  ;;  %v192_v54 = vrot.slane %v90_v52, 4  ;;  %v193_v55 = vrot.slane %v91_v53, 2  ;;  %v49_v53 = vld [vmem:[#allocation2 + $0x48] sm:$0xff] }
  0x5e   :  { %v253_v58 = vsel %vm239_vm1, %v192_v54, %v193_v55 }
  0x5f   :  { %v254_v59 = vsel %vm241_vm2, %v252_v57, %v253_v58 }
  0x60   :  { %v322_v60 = vadd.f32 %v254_v59, %v44_v56 }
  0x62   :  { %342 = vst [vmem:[#allocation7 + $0x20] sm:$0xff] %v322_v60 }
  0x63   :  { %v93_v61 = vld.sshfl [vmem:[#allocation1] sm:$0xff pattern:$0x73625140]  ;;  %v94_v62 = vld.sshfl [vmem:[#allocation1 + $0x8] sm:$0xff pattern:$0x73625140] }
  0x64   :  { %95 = vst [vmem:[#allocation1] ss:$4 sm:$0xff] %v481_v0  ;;  %v194_v63 = vrot.slane %v94_v62, 6 }
  0x66   :  { %v255_v6 = vsel %vm237_vm0, %v93_v61, %v194_v63 }
  0x6b   :  { %v96_v1 = vld.sshfl [vmem:[#allocation1] sm:$0xff pattern:$0x73625140]  ;;  %v97_v2 = vld.sshfl [vmem:[#allocation1 + $0x8] sm:$0xff pattern:$0x73625140] }
  0x6c   :  { %98 = vst [vmem:[#allocation1] ss:$4 sm:$0xff] %v481_v0  ;;  %v195_v3 = vrot.slane %v96_v1, 4  ;;  %v196_v4 = vrot.slane %v97_v2, 2  ;;  %v50_v2 = vld [vmem:[#allocation2 + $0x50] sm:$0xff] }
  0x6e   :  { %v256_v7 = vsel %vm239_vm1, %v195_v3, %v196_v4 }
  0x6f   :  { %v257_v8 = vsel %vm241_vm2, %v255_v6, %v256_v7 }
  0x70   :  { %v323_v9 = vadd.f32 %v257_v8, %v45_v5 }
  0x72   :  { %343 = vst [vmem:[#allocation7 + $0x28] sm:$0xff] %v323_v9 }
  0x73   :  { %v99_v10 = vld.sshfl [vmem:[#allocation1] sm:$0xff pattern:$0x73625140]  ;;  %v100_v11 = vld.sshfl [vmem:[#allocation1 + $0x8] sm:$0xff pattern:$0x73625140] }
  0x74   :  { %101 = vst [vmem:[#allocation1] ss:$4 sm:$0xff] %v481_v0  ;;  %v197_v12 = vrot.slane %v100_v11, 6 }
  0x76   :  { %v258_v18 = vsel %vm237_vm0, %v99_v10, %v197_v12 }
  0x7b   :  { %v102_v13 = vld.sshfl [vmem:[#allocation1] sm:$0xff pattern:$0x73625140]  ;;  %v103_v14 = vld.sshfl [vmem:[#allocation1 + $0x8] sm:$0xff pattern:$0x73625140] }
  0x7c   :  { %104 = vst [vmem:[#allocation1] ss:$4 sm:$0xff] %v481_v0  ;;  %v198_v15 = vrot.slane %v102_v13, 4  ;;  %v199_v16 = vrot.slane %v103_v14, 2  ;;  %v51_v14 = vld [vmem:[#allocation2 + $0x58] sm:$0xff] }
  0x7e   :  { %v259_v19 = vsel %vm239_vm1, %v198_v15, %v199_v16 }
  0x7f   :  { %v260_v20 = vsel %vm241_vm2, %v258_v18, %v259_v19 }
  0x80   :  { %v324_v21 = vadd.f32 %v260_v20, %v46_v17 }
  0x82   :  { %344 = vst [vmem:[#allocation7 + $0x30] sm:$0xff] %v324_v21 }
  0x83   :  { %v105_v22 = vld.sshfl [vmem:[#allocation1] sm:$0xff pattern:$0x73625140]  ;;  %v106_v23 = vld.sshfl [vmem:[#allocation1 + $0x8] sm:$0xff pattern:$0x73625140] }
  0x84   :  { %107 = vst [vmem:[#allocation1] ss:$4 sm:$0xff] %v481_v0  ;;  %v200_v24 = vrot.slane %v106_v23, 6 }
  0x86   :  { %v261_v30 = vsel %vm237_vm0, %v105_v22, %v200_v24 }
  0x8b   :  { %v108_v25 = vld.sshfl [vmem:[#allocation1] sm:$0xff pattern:$0x73625140]  ;;  %v109_v26 = vld.sshfl [vmem:[#allocation1 + $0x8] sm:$0xff pattern:$0x73625140] }
  0x8c   :  { %110 = vst [vmem:[#allocation1] ss:$4 sm:$0xff] %v481_v0  ;;  %v201_v27 = vrot.slane %v108_v25, 4  ;;  %v202_v28 = vrot.slane %v109_v26, 2  ;;  %v52_v26 = vld [vmem:[#allocation2 + $0x60] sm:$0xff] }
  0x8e   :  { %v262_v31 = vsel %vm239_vm1, %v201_v27, %v202_v28 }
  0x8f   :  { %v263_v32 = vsel %vm241_vm2, %v261_v30, %v262_v31 }
  0x90   :  { %v325_v33 = vadd.f32 %v263_v32, %v47_v29 }
  0x92   :  { %345 = vst [vmem:[#allocation7 + $0x38] sm:$0xff] %v325_v33 }
  0x93   :  { %v111_v34 = vld.sshfl [vmem:[#allocation1] sm:$0xff pattern:$0x73625140]  ;;  %v112_v35 = vld.sshfl [vmem:[#allocation1 + $0x8] sm:$0xff pattern:$0x73625140] }
  0x94   :  { %113 = vst [vmem:[#allocation1] ss:$4 sm:$0xff] %v481_v0  ;;  %v203_v36 = vrot.slane %v112_v35, 6 }
  0x96   :  { %v264_v42 = vsel %vm237_vm0, %v111_v34, %v203_v36 }
  0x9b   :  { %v114_v37 = vld.sshfl [vmem:[#allocation1] sm:$0xff pattern:$0x73625140]  ;;  %v115_v38 = vld.sshfl [vmem:[#allocation1 + $0x8] sm:$0xff pattern:$0x73625140] }
  0x9c   :  { %116 = vst [vmem:[#allocation1] ss:$4 sm:$0xff] %v481_v0  ;;  %v204_v39 = vrot.slane %v114_v37, 4  ;;  %v205_v40 = vrot.slane %v115_v38, 2  ;;  %v53_v38 = vld [vmem:[#allocation2 + $0x68] sm:$0xff] }
  0x9e   :  { %v265_v43 = vsel %vm239_vm1, %v204_v39, %v205_v40 }
  0x9f   :  { %v266_v44 = vsel %vm241_vm2, %v264_v42, %v265_v43 }
  0xa0   :  { %v326_v45 = vadd.f32 %v266_v44, %v48_v41 }
  0xa2   :  { %346 = vst [vmem:[#allocation7 + $0x40] sm:$0xff] %v326_v45 }
  0xa3   :  { %v117_v46 = vld.sshfl [vmem:[#allocation1] sm:$0xff pattern:$0x73625140]  ;;  %v118_v47 = vld.sshfl [vmem:[#allocation1 + $0x8] sm:$0xff pattern:$0x73625140] }
  0xa4   :  { %119 = vst [vmem:[#allocation1] ss:$4 sm:$0xff] %v481_v0  ;;  %v206_v48 = vrot.slane %v118_v47, 6 }
  0xa6   :  { %v267_v54 = vsel %vm237_vm0, %v117_v46, %v206_v48 }
  0xab   :  { %v120_v49 = vld.sshfl [vmem:[#allocation1] sm:$0xff pattern:$0x73625140]  ;;  %v121_v50 = vld.sshfl [vmem:[#allocation1 + $0x8] sm:$0xff pattern:$0x73625140] }
  0xac   :  { %122 = vst [vmem:[#allocation1] ss:$4 sm:$0xff] %v481_v0  ;;  %v207_v51 = vrot.slane %v120_v49, 4  ;;  %v208_v52 = vrot.slane %v121_v50, 2  ;;  %v54_v50 = vld [vmem:[#allocation2 + $0x70] sm:$0xff] }
  0xae   :  { %v268_v55 = vsel %vm239_vm1, %v207_v51, %v208_v52 }
  0xaf   :  { %v269_v56 = vsel %vm241_vm2, %v267_v54, %v268_v55 }
  0xb0   :  { %v327_v57 = vadd.f32 %v269_v56, %v49_v53 }
  0xb2   :  { %347 = vst [vmem:[#allocation7 + $0x48] sm:$0xff] %v327_v57 }
  0xb3   :  { %v123_v58 = vld.sshfl [vmem:[#allocation1] sm:$0xff pattern:$0x73625140]  ;;  %v124_v59 = vld.sshfl [vmem:[#allocation1 + $0x8] sm:$0xff pattern:$0x73625140] }
  0xb4   :  { %125 = vst [vmem:[#allocation1] ss:$4 sm:$0xff] %v481_v0  ;;  %v209_v60 = vrot.slane %v124_v59, 6 }
  0xb6   :  { %v270_v3 = vsel %vm237_vm0, %v123_v58, %v209_v60 }
  0xbb   :  { %v126_v61 = vld.sshfl [vmem:[#allocation1] sm:$0xff pattern:$0x73625140]  ;;  %v127_v62 = vld.sshfl [vmem:[#allocation1 + $0x8] sm:$0xff pattern:$0x73625140] }
  0xbc   :  { %128 = vst [vmem:[#allocation1] ss:$4 sm:$0xff] %v481_v0  ;;  %v210_v63 = vrot.slane %v126_v61, 4  ;;  %v211_v1 = vrot.slane %v127_v62, 2  ;;  %v55_v62 = vld [vmem:[#allocation2 + $0x78] sm:$0xff] }
  0xbe   :  { %v271_v4 = vsel %vm239_vm1, %v210_v63, %v211_v1 }
  0xbf   :  { %v272_v5 = vsel %vm241_vm2, %v270_v3, %v271_v4 }
  0xc0   :  { %v328_v6 = vadd.f32 %v272_v5, %v50_v2 }
  0xc2   :  { %348 = vst [vmem:[#allocation7 + $0x50] sm:$0xff] %v328_v6 }
  0xc3   :  { %v129_v7 = vld.sshfl [vmem:[#allocation1] sm:$0xff pattern:$0x73625140]  ;;  %v130_v8 = vld.sshfl [vmem:[#allocation1 + $0x8] sm:$0xff pattern:$0x73625140] }
  0xc4   :  { %131 = vst [vmem:[#allocation1] ss:$4 sm:$0xff] %v481_v0  ;;  %v212_v9 = vrot.slane %v130_v8, 6 }
  0xc6   :  { %v273_v15 = vsel %vm237_vm0, %v129_v7, %v212_v9 }
  0xcb   :  { %v132_v10 = vld.sshfl [vmem:[#allocation1] sm:$0xff pattern:$0x73625140]  ;;  %v133_v11 = vld.sshfl [vmem:[#allocation1 + $0x8] sm:$0xff pattern:$0x73625140] }
  0xcc   :  { %134 = vst [vmem:[#allocation1] ss:$4 sm:$0xff] %v481_v0  ;;  %v213_v12 = vrot.slane %v132_v10, 4  ;;  %v214_v13 = vrot.slane %v133_v11, 2  ;;  %v56_v11 = vld [vmem:[#allocation2 + $0x80] sm:$0xff] }
  0xce   :  { %v274_v16 = vsel %vm239_vm1, %v213_v12, %v214_v13 }
  0xcf   :  { %v275_v17 = vsel %vm241_vm2, %v273_v15, %v274_v16 }
  0xd0   :  { %v329_v18 = vadd.f32 %v275_v17, %v51_v14 }
  0xd2   :  { %349 = vst [vmem:[#allocation7 + $0x58] sm:$0xff] %v329_v18 }
  0xd3   :  { %v135_v19 = vld.sshfl [vmem:[#allocation1] sm:$0xff pattern:$0x73625140]  ;;  %v136_v20 = vld.sshfl [vmem:[#allocation1 + $0x8] sm:$0xff pattern:$0x73625140] }
  0xd4   :  { %137 = vst [vmem:[#allocation1] ss:$4 sm:$0xff] %v481_v0  ;;  %v215_v21 = vrot.slane %v136_v20, 6 }
  0xd6   :  { %v276_v27 = vsel %vm237_vm0, %v135_v19, %v215_v21 }
  0xdb   :  { %v138_v22 = vld.sshfl [vmem:[#allocation1] sm:$0xff pattern:$0x73625140]  ;;  %v139_v23 = vld.sshfl [vmem:[#allocation1 + $0x8] sm:$0xff pattern:$0x73625140] }
  0xdc   :  { %140 = vst [vmem:[#allocation1] ss:$4 sm:$0xff] %v481_v0  ;;  %v216_v24 = vrot.slane %v138_v22, 4  ;;  %v217_v25 = vrot.slane %v139_v23, 2  ;;  %v57_v23 = vld [vmem:[#allocation2 + $0x88] sm:$0xff] }
  0xde   :  { %v277_v28 = vsel %vm239_vm1, %v216_v24, %v217_v25 }
  0xdf   :  { %v278_v29 = vsel %vm241_vm2, %v276_v27, %v277_v28 }
  0xe0   :  { %v330_v30 = vadd.f32 %v278_v29, %v52_v26 }
  0xe2   :  { %350 = vst [vmem:[#allocation7 + $0x60] sm:$0xff] %v330_v30 }
  0xe3   :  { %v141_v31 = vld.sshfl [vmem:[#allocation1] sm:$0xff pattern:$0x73625140]  ;;  %v142_v32 = vld.sshfl [vmem:[#allocation1 + $0x8] sm:$0xff pattern:$0x73625140] }
  0xe4   :  { %143 = vst [vmem:[#allocation1] ss:$4 sm:$0xff] %v481_v0  ;;  %v218_v33 = vrot.slane %v142_v32, 6 }
  0xe6   :  { %v279_v39 = vsel %vm237_vm0, %v141_v31, %v218_v33 }
  0xeb   :  { %v144_v34 = vld.sshfl [vmem:[#allocation1] sm:$0xff pattern:$0x73625140]  ;;  %v145_v35 = vld.sshfl [vmem:[#allocation1 + $0x8] sm:$0xff pattern:$0x73625140] }
  0xec   :  { %146 = vst [vmem:[#allocation1] ss:$4 sm:$0xff] %v481_v0  ;;  %v219_v36 = vrot.slane %v144_v34, 4  ;;  %v220_v37 = vrot.slane %v145_v35, 2  ;;  %v58_v35 = vld [vmem:[#allocation2 + $0x90] sm:$0xff] }
  0xee   :  { %v280_v40 = vsel %vm239_vm1, %v219_v36, %v220_v37 }
  0xef   :  { %v281_v41 = vsel %vm241_vm2, %v279_v39, %v280_v40 }
  0xf0   :  { %v331_v42 = vadd.f32 %v281_v41, %v53_v38  ;;  %v59_v41 = vld [vmem:[#allocation2 + $0x98] sm:$0xf] }
  0xf2   :  { %351 = vst [vmem:[#allocation7 + $0x68] sm:$0xff] %v331_v42 }
  0xf3   :  { %v147_v43 = vld.sshfl [vmem:[#allocation1] sm:$0xff pattern:$0x73625140]  ;;  %v148_v44 = vld.sshfl [vmem:[#allocation1 + $0x8] sm:$0xff pattern:$0x73625140] }
  0xf4   :  { %149 = vst [vmem:[#allocation1] ss:$4 sm:$0xff] %v481_v0  ;;  %v221_v45 = vrot.slane %v148_v44, 6 }
  0xf6   :  { %v282_v51 = vsel %vm237_vm0, %v147_v43, %v221_v45 }
  0xfb   :  { %v150_v46 = vld.sshfl [vmem:[#allocation1] sm:$0xff pattern:$0x73625140]  ;;  %v151_v47 = vld.sshfl [vmem:[#allocation1 + $0x8] sm:$0xff pattern:$0x73625140] }
  0xfc   :  { %152 = vst [vmem:[#allocation1] ss:$4 sm:$0xff] %v481_v0  ;;  %v222_v48 = vrot.slane %v150_v46, 4  ;;  %v223_v49 = vrot.slane %v151_v47, 2 }
  0xfe   :  { %v283_v52 = vsel %vm239_vm1, %v222_v48, %v223_v49 }
  0xff   :  { %v284_v53 = vsel %vm241_vm2, %v282_v51, %v283_v52 }
 0x100   :  { %v332_v54 = vadd.f32 %v284_v53, %v54_v50 }
 0x102   :  { %352 = vst [vmem:[#allocation7 + $0x70] sm:$0xff] %v332_v54 }
 0x103   :  { %v153_v55 = vld.sshfl [vmem:[#allocation1] sm:$0xff pattern:$0x73625140]  ;;  %v154_v56 = vld.sshfl [vmem:[#allocation1 + $0x8] sm:$0xff pattern:$0x73625140] }
 0x104   :  { %155 = vst [vmem:[#allocation1] ss:$4 sm:$0xff] %v481_v0  ;;  %v224_v57 = vrot.slane %v154_v56, 6 }
 0x106   :  { %v285_v63 = vsel %vm237_vm0, %v153_v55, %v224_v57 }
 0x10b   :  { %v156_v58 = vld.sshfl [vmem:[#allocation1] sm:$0xff pattern:$0x73625140]  ;;  %v157_v59 = vld.sshfl [vmem:[#allocation1 + $0x8] sm:$0xff pattern:$0x73625140] }
 0x10c   :  { %158 = vst [vmem:[#allocation1] ss:$4 sm:$0xff] %v481_v0  ;;  %v225_v60 = vrot.slane %v156_v58, 4  ;;  %v226_v61 = vrot.slane %v157_v59, 2 }
 0x10e   :  { %v286_v1 = vsel %vm239_vm1, %v225_v60, %v226_v61 }
 0x10f   :  { %v287_v2 = vsel %vm241_vm2, %v285_v63, %v286_v1 }
 0x110   :  { %v333_v3 = vadd.f32 %v287_v2, %v55_v62 }
 0x112   :  { %353 = vst [vmem:[#allocation7 + $0x78] sm:$0xff] %v333_v3 }
 0x113   :  { %v159_v4 = vld.sshfl [vmem:[#allocation1] sm:$0xff pattern:$0x73625140]  ;;  %v160_v5 = vld.sshfl [vmem:[#allocation1 + $0x8] sm:$0xff pattern:$0x73625140] }
 0x114   :  { %161 = vst [vmem:[#allocation1] ss:$4 sm:$0xff] %v481_v0  ;;  %v227_v6 = vrot.slane %v160_v5, 6 }
 0x116   :  { %v288_v12 = vsel %vm237_vm0, %v159_v4, %v227_v6 }
 0x11b   :  { %v162_v7 = vld.sshfl [vmem:[#allocation1] sm:$0xff pattern:$0x73625140]  ;;  %v163_v8 = vld.sshfl [vmem:[#allocation1 + $0x8] sm:$0xff pattern:$0x73625140] }
 0x11c   :  { %164 = vst [vmem:[#allocation1] ss:$4 sm:$0xff] %v481_v0  ;;  %v228_v9 = vrot.slane %v162_v7, 4  ;;  %v229_v10 = vrot.slane %v163_v8, 2 }
 0x11e   :  { %v289_v13 = vsel %vm239_vm1, %v228_v9, %v229_v10 }
 0x11f   :  { %v290_v14 = vsel %vm241_vm2, %v288_v12, %v289_v13 }
 0x120   :  { %v334_v15 = vadd.f32 %v290_v14, %v56_v11 }
 0x122   :  { %354 = vst [vmem:[#allocation7 + $0x80] sm:$0xff] %v334_v15 }
 0x123   :  { %v165_v16 = vld.sshfl [vmem:[#allocation1] sm:$0xff pattern:$0x73625140]  ;;  %v166_v17 = vld.sshfl [vmem:[#allocation1 + $0x8] sm:$0xff pattern:$0x73625140] }
 0x124   :  { %167 = vst [vmem:[#allocation1] ss:$4 sm:$0xff] %v481_v0  ;;  %v230_v18 = vrot.slane %v166_v17, 6 }
 0x126   :  { %v291_v24 = vsel %vm237_vm0, %v165_v16, %v230_v18 }
 0x12b   :  { %v168_v19 = vld.sshfl [vmem:[#allocation1] sm:$0xff pattern:$0x73625140]  ;;  %v169_v20 = vld.sshfl [vmem:[#allocation1 + $0x8] sm:$0xff pattern:$0x73625140] }
 0x12c   :  { %170 = vst [vmem:[#allocation1] ss:$4 sm:$0xff] %v481_v0  ;;  %v231_v21 = vrot.slane %v168_v19, 4  ;;  %v232_v22 = vrot.slane %v169_v20, 2 }
 0x12e   :  { %v292_v25 = vsel %vm239_vm1, %v231_v21, %v232_v22 }
 0x12f   :  { %v293_v26 = vsel %vm241_vm2, %v291_v24, %v292_v25 }
 0x130   :  { %v335_v27 = vadd.f32 %v293_v26, %v57_v23 }
 0x132   :  { %355 = vst [vmem:[#allocation7 + $0x88] sm:$0xff] %v335_v27 }
 0x133   :  { %v171_v28 = vld.sshfl [vmem:[#allocation1] sm:$0xff pattern:$0x73625140]  ;;  %v172_v29 = vld.sshfl [vmem:[#allocation1 + $0x8] sm:$0xff pattern:$0x73625140] }
 0x134   :  { %173 = vst [vmem:[#allocation1] ss:$4 sm:$0xff] %v481_v0  ;;  %v233_v30 = vrot.slane %v172_v29, 6 }
 0x136   :  { %v294_v36 = vsel %vm237_vm0, %v171_v28, %v233_v30 }
 0x13b   :  { %v174_v31 = vld.sshfl [vmem:[#allocation1] sm:$0xff pattern:$0x73625140]  ;;  %v175_v32 = vld.sshfl [vmem:[#allocation1 + $0x8] sm:$0xff pattern:$0x73625140] }
 0x13c   :  { %176 = vst [vmem:[#allocation1] ss:$4 sm:$0xff] %v481_v0  ;;  %v234_v33 = vrot.slane %v174_v31, 4  ;;  %v235_v34 = vrot.slane %v175_v32, 2 }
 0x13e   :  { %v295_v37 = vsel %vm239_vm1, %v234_v33, %v235_v34 }
 0x13f   :  { %v296_v38 = vsel %vm241_vm2, %v294_v36, %v295_v37 }
 0x140   :  { %v336_v39 = vadd.f32 %v296_v38, %v58_v35 }
 0x142   :  { %356 = vst [vmem:[#allocation7 + $0x90] sm:$0xff] %v336_v39 }
 0x143   :  { %v178_v40 = vld.sshfl [vmem:[#allocation1 + $0x8] sm:$0xff pattern:$0x73625140]  ;;  %v177_v0 = vld.sshfl [vmem:[#allocation1] sm:$0xff pattern:$0x73625140] }
 0x144   :  { %v236_v42 = vrot.slane %v178_v40, 6 }
 0x146   :  { %v297_v43 = vsel %vm237_vm0, %v177_v0, %v236_v42 }
 0x147   :  { %v337_v44 = vadd.f32 %v297_v43, %v59_v41 }
 0x149   :  { %357 = vst [vmem:[#allocation7 + $0x98] sm:$0xf] %v337_v44 }
 0x14a   :  { %368 = dma.vmem_to_hbm [thread:$0]  %s364_s1, 2496, %s366_s21, [#allocation4]  }
 0x14b   :  { %455 = dma.done.wait [#allocation4], 2496  }
 0x14c   :  { %456 = vsyncadd [#allocation4], 4294964800 }
 0x14d   :  { %373 = vsyncpa [#allocation3], 1 }
 0x14e   :  { %374 = vsyncpa [#allocation6], 1 }
 0x14f   :  { %375 = vsyncpa [#allocation4], 1 }

</bundles_post_ra>
